<compile_context>
chip_gen: v7x
topology: tpu7x:2x2x1
jax: 0.10.0
libtpu: 0.0.40
codegen_flags: <defaults>
</compile_context>

<pallas_src>
import functools
import math

import jax
import jax.numpy as jnp
from jax.experimental import pallas as pl
from jax.experimental.pallas import tpu as pltpu


def _round_up(x, m):
    return ((x + m - 1) // m) * m


# ----------------------------------------------------------------------------
# Pass 1: augmented projection  [h @ [W^T | W^T a1 | W^T a2] + b_aug]
# ----------------------------------------------------------------------------
def _gat_project_kernel(h_ref, w_ref, b_ref, wh_ref, f1_ref, f2_ref, *, fout):
    acc = jnp.dot(h_ref[...], w_ref[...], preferred_element_type=jnp.float32)
    acc = acc + b_ref[...]                                   # [tm, Fcols]
    wh_ref[...] = acc[:, :fout].astype(wh_ref.dtype)         # Wh   (bf16)
    f1_ref[...] = acc[:, fout:fout + 1]                      # Wh@a1 + b_a
    f2_ref[...] = acc[:, fout + 1:fout + 2]                  # Wh@a2


# ----------------------------------------------------------------------------
# Pass 2: masked softmax + aggregation (flash-style online softmax)
# ----------------------------------------------------------------------------
def _gat_attend_kernel(f1_ref, f2t_ref, adj_ref, wh_ref, out_ref,
                       m_sc, l_sc, acc_sc, *,
                       alpha: float, concat: bool, tk: int, wh_resident: bool):
    k = pl.program_id(1)

    @pl.when(k == 0)
    def _():
        m_sc[...] = jnp.full_like(m_sc, -jnp.inf)
        l_sc[...] = jnp.zeros_like(l_sc)
        acc_sc[...] = jnp.zeros_like(acc_sc)

    # e[i,j] = leakyrelu(f1[i] + f2[j])   (b_a already folded into f1)
    e = f1_ref[...] + f2t_ref[...]                           # [tm, tk]
    if 0.0 <= alpha <= 1.0:
        e = jnp.maximum(e, alpha * e)                        # LeakyReLU, 1 VPU max
    else:
        e = jnp.where(e > 0, e, alpha * e)
    # scalar-constant mask (no [tm,tk] constant materialization)
    e = jnp.where(adj_ref[...] > 0, e, -9000000000000000.0)

    m_prev = m_sc[...]
    m_new = jnp.maximum(m_prev, jnp.max(e, axis=1, keepdims=True))
    corr = jnp.exp(m_prev - m_new)
    p = jnp.exp(e - m_new)                                   # unnormalized probs
    l_sc[...] = corr * l_sc[...] + jnp.sum(p, axis=1, keepdims=True)

    if wh_resident:
        # Wh lives fully in VMEM; slice the key block locally (no re-stream).
        start = pl.multiple_of(k * tk, tk)
        whk = wh_ref[pl.ds(start, tk), :]
    else:
        whk = wh_ref[...]
    # bf16 x bf16 MXU matmul, f32 accumulate (dominant FLOP term)
    acc_sc[...] = corr * acc_sc[...] + jnp.dot(
        p.astype(jnp.bfloat16), whk, preferred_element_type=jnp.float32)
    m_sc[...] = m_new

    @pl.when(k == pl.num_programs(1) - 1)
    def _():
        # normalization kept out of the N^2 path; approx recip -> EUP slot
        h_prime = acc_sc[...] * pl.reciprocal(l_sc[...], approx=True)
        if concat:
            # ELU (alpha=1); clamp the exp argument so positives don't blow up
            out_ref[...] = jnp.where(
                h_prime > 0, h_prime,
                jnp.exp(jnp.minimum(h_prime, 0.0)) - 1.0)
        else:
            out_ref[...] = h_prime


# ----------------------------------------------------------------------------
# Wrapper
# ----------------------------------------------------------------------------
def gat_forward(h, adj, W, bW, a, ba, *, alpha=0.2, concat=True,
                block_m=256, block_k=512):
    """Pallas GAT layer forward (eval mode).

    h   : [N, Fin]      node features
    adj : [N, N]        adjacency (>0 means edge)
    W   : [Fout, Fin]   nn.Linear(in,out).weight
    bW  : [Fout]        nn.Linear(in,out).bias
    a   : [1, 2*Fout]   nn.Linear(2*out,1).weight
    ba  : [1]           nn.Linear(2*out,1).bias
    """
    N, Fin = h.shape
    Fout = W.shape[0]

    h = jnp.asarray(h, jnp.float32)
    W = jnp.asarray(W, jnp.float32)
    bW = jnp.asarray(bW, jnp.float32)
    a = jnp.asarray(a, jnp.float32)
    ba = jnp.asarray(ba, jnp.float32)

    # ---- tile selection ----------------------------------------------------
    # keep >= 2 row blocks when the graph allows it (v7x has 2 TensorCores and
    # shards the "parallel" axis across them)
    tm = block_m
    while tm > 16 and pl.cdiv(N, tm) < 2:
        tm //= 2
    tk = block_k
    while tk > 128 and tk // 2 >= N:     # don't tile wider than the graph
        tk //= 2
    N_pad = _round_up(N, math.lcm(tm, tk))
    n_row = N_pad // tm
    n_col = N_pad // tk

    # ---- pad inputs to the tile multiple (padded keys masked via adj=0) ----
    if N_pad != N:
        h = jnp.pad(h, ((0, N_pad - N), (0, 0)))
    adj_i8 = (jnp.asarray(adj) > 0).astype(jnp.int8)   # int8: 4x less DMA/VMEM
    if N_pad != N:
        adj_i8 = jnp.pad(adj_i8, ((0, N_pad - N), (0, N_pad - N)))

    # ---- fold attention matvecs + b_a into the projection weights ----------
    Fcols = _round_up(Fout + 2, 128)                   # lane-dense pass-1 output
    wT = W.T                                           # [Fin, Fout]
    a1 = a[0, :Fout]
    a2 = a[0, Fout:]
    w_aug = jnp.zeros((Fin, Fcols), jnp.float32)
    w_aug = w_aug.at[:, :Fout].set(wT)
    w_aug = w_aug.at[:, Fout].set(wT @ a1)
    w_aug = w_aug.at[:, Fout + 1].set(wT @ a2)
    b_aug = jnp.zeros((1, Fcols), jnp.float32)
    b_aug = b_aug.at[0, :Fout].set(bW)
    b_aug = b_aug.at[0, Fout].set(bW @ a1 + ba[0])
    b_aug = b_aug.at[0, Fout + 1].set(bW @ a2)

    # ---------------- pass 1: Wh (bf16), f1, f2 ----------------
    kernel1 = functools.partial(_gat_project_kernel, fout=Fout)
    wh, f1, f2 = pl.pallas_call(
        kernel1,
        out_shape=(jax.ShapeDtypeStruct((N_pad, Fout), jnp.bfloat16),
                   jax.ShapeDtypeStruct((N_pad, 1), jnp.float32),
                   jax.ShapeDtypeStruct((N_pad, 1), jnp.float32)),
        grid_spec=pltpu.PrefetchScalarGridSpec(
            num_scalar_prefetch=0,
            grid=(n_row,),
            in_specs=[
                pl.BlockSpec((tm, Fin), lambda i: (i, 0)),
                pl.BlockSpec((Fin, Fcols), lambda i: (0, 0)),
                pl.BlockSpec((1, Fcols), lambda i: (0, 0)),
            ],
            out_specs=[
                pl.BlockSpec((tm, Fout), lambda i: (i, 0)),
                pl.BlockSpec((tm, 1), lambda i: (i, 0)),
                pl.BlockSpec((tm, 1), lambda i: (i, 0)),
            ]),
        compiler_params=pltpu.CompilerParams(
            dimension_semantics=("parallel",),
            vmem_limit_bytes=32 * 1024 * 1024),
        cost_estimate=pl.CostEstimate(
            flops=2 * N_pad * Fin * Fcols,
            transcendentals=0,
            bytes_accessed=(4 * (N_pad * Fin + Fin * Fcols + 2 * N_pad)
                            + 2 * N_pad * Fout)),
    )(h, w_aug, b_aug)

    # f2 as a row vector for broadcast against f1 columns (O(N) relayout)
    f2t = f2.reshape(1, N_pad)

    # ---------------- pass 2: masked softmax + aggregation ----------------
    # Keep Wh resident in VMEM for moderate graphs (<=8 MiB bf16, so <=16 MiB
    # with double-buffering against the 32 MiB scoped budget on every gen).
    wh_resident = (N_pad * Fout * 2) <= (8 * 1024 * 1024)
    if wh_resident:
        wh_spec = pl.BlockSpec((N_pad, Fout), lambda i, k: (0, 0))
    else:
        wh_spec = pl.BlockSpec((tk, Fout), lambda i, k: (k, 0))

    kernel2 = functools.partial(
        _gat_attend_kernel, alpha=float(alpha), concat=bool(concat),
        tk=tk, wh_resident=wh_resident)
    out = pl.pallas_call(
        kernel2,
        out_shape=jax.ShapeDtypeStruct((N_pad, Fout), jnp.float32),
        grid_spec=pltpu.PrefetchScalarGridSpec(
            num_scalar_prefetch=0,
            grid=(n_row, n_col),                 # key/column (reduction) axis last
            in_specs=[
                pl.BlockSpec((tm, 1), lambda i, k: (i, 0)),    # f1  (column)
                pl.BlockSpec((1, tk), lambda i, k: (0, k)),    # f2^T (row)
                pl.BlockSpec((tm, tk), lambda i, k: (i, k)),   # adjacency int8
                wh_spec,                                       # Wh (bf16)
            ],
            out_specs=pl.BlockSpec((tm, Fout), lambda i, k: (i, 0)),
            scratch_shapes=[
                pltpu.VMEM((tm, 1), jnp.float32),      # running max m
                pltpu.VMEM((tm, 1), jnp.float32),      # running sum l
                pltpu.VMEM((tm, Fout), jnp.float32),   # accumulator
            ]),
        compiler_params=pltpu.CompilerParams(
            dimension_semantics=("parallel", "arbitrary"),
            vmem_limit_bytes=32 * 1024 * 1024),
        cost_estimate=pl.CostEstimate(
            flops=2 * N_pad * N_pad * Fout + 10 * N_pad * N_pad,
            transcendentals=N_pad * N_pad + 2 * N_pad * n_col,
            bytes_accessed=(N_pad * N_pad                       # int8 adjacency
                            + (1 if wh_resident else n_row) * N_pad * Fout * 2
                            + N_pad * Fout * 4                  # output
                            + 12 * N_pad)),
    )(f1, f2t, adj_i8, wh)

    return out[:N] if N_pad != N else out


# ----------------------------------------------------------------------------
# Pure-JAX reference (matches PyTorch forward, eval mode)
# ----------------------------------------------------------------------------
def gat_reference(h, adj, W, bW, a, ba, *, alpha=0.2, concat=True):
    Wh = h @ W.T + bW                                   # [N, Fout]
    Fout = W.shape[0]
    f1 = Wh @ a[0, :Fout]                               # [N]
    f2 = Wh @ a[0, Fout:]                               # [N]
    e = f1[:, None] + f2[None, :] + ba[0]
    e = jnp.where(e > 0, e, alpha * e)
    att = jnp.where(adj > 0, e, -9000000000000000.0)
    att = jax.nn.softmax(att, axis=1)
    h_prime = att @ Wh
    return jax.nn.elu(h_prime) if concat else h_prime


if __name__ == "__main__":
    # module config (lane-dense Fout, enough rows for 2 row blocks)
    N = 512              # number of graph nodes
    IN_FEATURES = 64
    OUT_FEATURES = 128   # multiple of 128 -> unmasked lane-dense stores
    ALPHA = 0.2          # LeakyReLU negative slope
    DROPOUT = 0.0        # eval-mode / no dropout

    key = jax.random.PRNGKey(0)
    k_h, k_adj, k_w, k_bw, k_a, k_ba = jax.random.split(key, 6)

    # deterministic inputs
    h = jax.random.normal(k_h, (N, IN_FEATURES), dtype=jnp.float32)
    adj = (jax.random.uniform(k_adj, (N, N)) > 0.7).astype(jnp.float32)
    adj = jnp.maximum(adj, jnp.eye(N, dtype=jnp.float32))  # self-loops

    # deterministic parameters (shapes from nn.Linear in __init__)
    W = jax.random.normal(k_w, (OUT_FEATURES, IN_FEATURES), jnp.float32) * 0.1
    bW = jax.random.normal(k_bw, (OUT_FEATURES,), jnp.float32) * 0.1
    a = jax.random.normal(k_a, (1, 2 * OUT_FEATURES), jnp.float32) * 0.1
    ba = jax.random.normal(k_ba, (1,), jnp.float32) * 0.1

    # bf16 MXU path -> relaxed tolerance vs the f32 reference
    ATOL = 3e-2
    RTOL = 3e-2

    # concat=True path (ELU)
    out = gat_forward(h, adj, W, bW, a, ba, alpha=ALPHA, concat=True)
    out = jax.block_until_ready(out)
    ref = gat_reference(h, adj, W, bW, a, ba, alpha=ALPHA, concat=True)
    assert out.shape == (N, OUT_FEATURES)
    assert jnp.allclose(out, ref, atol=ATOL, rtol=RTOL), (
        f"concat=True max abs err {jnp.max(jnp.abs(out - ref))}")

    # concat=False path (no ELU)
    out2 = gat_forward(h, adj, W, bW, a, ba, alpha=ALPHA, concat=False)
    out2 = jax.block_until_ready(out2)
    ref2 = gat_reference(h, adj, W, bW, a, ba, alpha=ALPHA, concat=False)
    assert jnp.allclose(out2, ref2, atol=ATOL, rtol=RTOL), (
        f"concat=False max abs err {jnp.max(jnp.abs(out2 - ref2))}")

    # non-tile-multiple N exercises the padding path (no full-N fallback)
    Np = 300
    hp = h[:Np]
    adjp = adj[:Np, :Np]                 # self-loops preserved
    out3 = gat_forward(hp, adjp, W, bW, a, ba, alpha=ALPHA, concat=True)
    out3 = jax.block_until_ready(out3)
    ref3 = gat_reference(hp, adjp, W, bW, a, ba, alpha=ALPHA, concat=True)
    assert out3.shape == (Np, OUT_FEATURES)
    assert jnp.allclose(out3, ref3, atol=ATOL, rtol=RTOL), (
        f"padded-N max abs err {jnp.max(jnp.abs(out3 - ref3))}")

    print("KERNEL_OK")
</pallas_src>

<mosaic_0001>
module attributes {stable_mosaic.version = 11 : i64} {
  func.func @_gat_project_kernel(%arg0: i32, %arg1: memref<256x64xf32, #tpu.memory_space<vmem>>, %arg2: memref<64x256xf32, #tpu.memory_space<vmem>>, %arg3: memref<1x256xf32, #tpu.memory_space<vmem>>, %arg4: memref<256x128xbf16, #tpu.memory_space<vmem>>, %arg5: memref<256x1xf32, #tpu.memory_space<vmem>>, %arg6: memref<256x1xf32, #tpu.memory_space<vmem>>) attributes {dimension_semantics = [#tpu.dimension_semantics<parallel>], iteration_bounds = array<i64: 2>, scalar_prefetch = 0 : i64, scratch_operands = 0 : i64, tpu.core_type = #tpu.core_type<tc>, window_params = [{transform_indices = @transform_0, window_bounds = array<i64: 256, 64>}, {pipeline_mode = #tpu.pipeline_mode<synchronous>, transform_indices = @transform_1, window_bounds = array<i64: 64, 256>}, {pipeline_mode = #tpu.pipeline_mode<synchronous>, transform_indices = @transform_2, window_bounds = array<i64: 1, 256>}, {transform_indices = @transform_3, window_bounds = array<i64: 256, 128>}, {transform_indices = @transform_4, window_bounds = array<i64: 256, 1>}, {transform_indices = @transform_5, window_bounds = array<i64: 256, 1>}]} {
    %c0 = arith.constant 0 : index
    %c0_0 = arith.constant 0 : index
    %0 = vector.load %arg1[%c0, %c0_0] : memref<256x64xf32, #tpu.memory_space<vmem>>, vector<256x64xf32>
    %c0_1 = arith.constant 0 : index
    %c0_2 = arith.constant 0 : index
    %1 = vector.load %arg2[%c0_1, %c0_2] : memref<64x256xf32, #tpu.memory_space<vmem>>, vector<64x256xf32>
    %cst = arith.constant dense<0.000000e+00> : vector<256x256xf32>
    %2 = tpu.matmul %0, %1, %cst {dimension_numbers = #tpu.dot_dimension_numbers<[1], [0], [0], [1], [0, 0, 1, 1], [], []>} : vector<256x64xf32>, vector<64x256xf32>, vector<256x256xf32> -> vector<256x256xf32>
    %c0_3 = arith.constant 0 : index
    %c0_4 = arith.constant 0 : index
    %3 = vector.load %arg3[%c0_3, %c0_4] : memref<1x256xf32, #tpu.memory_space<vmem>>, vector<1x256xf32>
    %4 = vector.broadcast %3 : vector<1x256xf32> to vector<256x256xf32>
    %5 = arith.addf %2, %4 : vector<256x256xf32>
    %6 = vector.extract_strided_slice %5 {offsets = [0, 0], sizes = [256, 128], strides = [1, 1]} : vector<256x256xf32> to vector<256x128xf32>
    %7 = arith.truncf %6 : vector<256x128xf32> to vector<256x128xbf16>
    %c0_5 = arith.constant 0 : index
    %c0_6 = arith.constant 0 : index
    %8 = vector.load %arg4[%c0_5, %c0_6] : memref<256x128xbf16, #tpu.memory_space<vmem>>, vector<256x128xbf16>
    tpu.vector_store %arg4[%c0_5, %c0_6], %7 {strides = array<i32>} : memref<256x128xbf16, #tpu.memory_space<vmem>>, vector<256x128xbf16>,
    %9 = vector.extract_strided_slice %5 {offsets = [0, 128], sizes = [256, 1], strides = [1, 1]} : vector<256x256xf32> to vector<256x1xf32>
    %c0_7 = arith.constant 0 : index
    %c0_8 = arith.constant 0 : index
    %10 = vector.load %arg5[%c0_7, %c0_8] : memref<256x1xf32, #tpu.memory_space<vmem>>, vector<256x1xf32>
    tpu.vector_store %arg5[%c0_7, %c0_8], %9 {strides = array<i32>} : memref<256x1xf32, #tpu.memory_space<vmem>>, vector<256x1xf32>,
    %11 = vector.extract_strided_slice %5 {offsets = [0, 129], sizes = [256, 1], strides = [1, 1]} : vector<256x256xf32> to vector<256x1xf32>
    %c0_9 = arith.constant 0 : index
    %c0_10 = arith.constant 0 : index
    %12 = vector.load %arg6[%c0_9, %c0_10] : memref<256x1xf32, #tpu.memory_space<vmem>>, vector<256x1xf32>
    tpu.vector_store %arg6[%c0_9, %c0_10], %11 {strides = array<i32>} : memref<256x1xf32, #tpu.memory_space<vmem>>, vector<256x1xf32>,
    return
  }
  func.func @transform_0(%arg0: i32) -> (i32, i32) {
    %c0_i32 = arith.constant 0 : i32
    %c0_i32_0 = arith.constant 0 : i32
    return %arg0, %c0_i32 : i32, i32
  }
  func.func @transform_1(%arg0: i32) -> (i32, i32) {
    %c0_i32 = arith.constant 0 : i32
    %c0_i32_0 = arith.constant 0 : i32
    %c0_i32_1 = arith.constant 0 : i32
    return %c0_i32, %c0_i32_0 : i32, i32
  }
  func.func @transform_2(%arg0: i32) -> (i32, i32) {
    %c0_i32 = arith.constant 0 : i32
    %c0_i32_0 = arith.constant 0 : i32
    %c0_i32_1 = arith.constant 0 : i32
    return %c0_i32, %c0_i32_0 : i32, i32
  }
  func.func @transform_3(%arg0: i32) -> (i32, i32) {
    %c0_i32 = arith.constant 0 : i32
    %c0_i32_0 = arith.constant 0 : i32
    return %arg0, %c0_i32 : i32, i32
  }
  func.func @transform_4(%arg0: i32) -> (i32, i32) {
    %c0_i32 = arith.constant 0 : i32
    %c0_i32_0 = arith.constant 0 : i32
    return %arg0, %c0_i32 : i32, i32
  }
  func.func @transform_5(%arg0: i32) -> (i32, i32) {
    %c0_i32 = arith.constant 0 : i32
    %c0_i32_0 = arith.constant 0 : i32
    return %arg0, %c0_i32 : i32, i32
  }
}

</mosaic_0001>

<bundles_post_ra>
// kernel: tpu_custom_call.1
= control target key start
LH: loop header
LB: loop body
LE: loop exit
PB: predicated region body
PF: predicated region fallthrough
CT: control target
= control target key end

     0   :  { %11 = vsyncpa [#allocation3], 0  ;;  %s2061_s0 = inlined_call_operand.vmem [shape: f32[512,64], index: 0, kind: input, shape index: {}]   ;;  %s2062_s1 = inlined_call_operand.vmem [shape: f32[64,256], index: 1, kind: input, shape index: {}]   ;;  %s2063_s2 = inlined_call_operand.vmem [shape: f32[1,256], index: 2, kind: input, shape index: {}]   ;;  %s2064_s3 = inlined_call_operand.hbm [shape: bf16[512,128], index: 3, kind: output, shape index: {0}]   ;;  %s2065_s4 = inlined_call_operand.vmem [shape: f32[512,1], index: 4, kind: output, shape index: {1}]   ;;  %s2066_s5 = inlined_call_operand.vmem [shape: f32[512,1], index: 5, kind: output, shape index: {2}]  }
   0x1   :  { %13 = vsyncpa [#allocation3 + $0x1], 0  ;;  %s1538_s18 = smov 0   ;;  %s1540_s19 = smov 0  }
   0x2   :  { %s1542_s20 = smov 0   ;;  %s1544_s21 = smov 0  }
   0x3 LB: > { %s1559_s22 = sadd.s32 4294967295, %s1501_s21   ;;  %s1164_s23 = sadd.s32 4294967294, %s1501_s21   ;;  %s1501_s21 = sphi %s1544_s21, %s2073_s21   ;;  %s1497_s20 = sphi %s1542_s20, %s2072_s20   ;;  %s1493_s19 = sphi %s1540_s19, %s2071_s19   ;;  %s1489_s18 = sphi %s1538_s18, %s2070_s18  }
   0x4   : > { %s1563_s24 = sadd.s32 1, %s1501_s21   ;;  %s94_s25 = sadd.s32 1, %s1497_s20 }
   0x5   : > { %s91_s26 = ssub.s32 %s1501_s21, %s1563_s24  ;;  %p104_p0 = scmp.ne.s32.totalorder %s1497_s20, %s1493_s19 }
   0x6   : > { %p92_p1 = scmp.eq.s32.totalorder %s91_s26, 0  ;;  %p105_p2 = scmp.eq.s32.totalorder %s1559_s22, 1 }
   0x7   : > { %p110_p3 = scmp.ne.s32.totalorder %s1493_s19, %s1489_s18  ;;  %p111_p4 = scmp.eq.s32.totalorder %s1164_s23, 1 }
   0x8   : > { %s1574_s27 = scalar_select %p92_p1, %s1497_s20, %s94_s25  }
   0x9   : > { %p1576_p5 = por %p105_p2, %p104_p0  ;;  %p1580_p6 = por %p111_p4, %p110_p3 }
   0xa   : > { %p1167_p7 = scmp.ge.s32.totalorder %s1501_s21, 1  ;;  %p196_p8 = scmp.lt.s32.totalorder %s1501_s21, 3 }
   0xc   : > { %p197_p9 = pnand %p1167_p7, %p196_p8 }
   0xd   : > { %v286_v0 = vld [vmem:[%s2062_s1 + $0x8] sm:$0xff] (!%p197_p9)  ;;  %v288_v1 = vld [vmem:[%s2062_s1 + $0x18] sm:$0xff] (!%p197_p9)  ;;  %v285_v2 = vld [vmem:[%s2062_s1] sm:$0xff] (!%p197_p9)  ;;  %s1169_s11 = sshll.u32 (!%p197_p9), %s1559_s22, 5  ;;  %v1503_v7 = vmov (!%p197_p9), 0.0   ;;  %vm313_vm0 = vcmask (!%p197_p9), 523264   ;;  %v303_v57 = vlaneseq (!%p197_p9) }
   0xe   : > { %200 = sbr.rel (%p197_p9) target bundleno = 437 (0x1b5), region = 32  ;;  %v1372_v3 = vpack.c.bf16 (!%p197_p9), %v288_v1, %v286_v0  ;;  %v287_v4 = vld [vmem:[%s2062_s1 + $0x10] sm:$0xff] (!%p197_p9)  ;;  %v290_v5 = vld [vmem:[%s2062_s1 + $0x28] sm:$0xff] (!%p197_p9)  ;;  %v292_v6 = vld [vmem:[%s2062_s1 + $0x38] sm:$0xff] (!%p197_p9)  ;;  %474 = vmatprep.mubr.f32.mxu0 (!%p197_p9), %v1503_v7  ;;  %570 = vmatprep.mubr.f32.mxu1 (!%p197_p9), %v1503_v7  ;;  %p1616_p10 = scmp.lt.s32.totalorder (!%p197_p9), %s1169_s11, 63  ;;  %vm827_vm1 = vcmask (!%p197_p9), 7168  }
   0xf   : > { %v1374_v8 = vpack.c.bf16 (!%p197_p9), %v287_v4, %v285_v2  ;;  %v1376_v9 = vpack.c.bf16 (!%p197_p9), %v292_v6, %v290_v5  ;;  %v289_v10 = vld [vmem:[%s2062_s1 + $0x20] sm:$0xff] (!%p197_p9)  ;;  %v291_v11 = vld [vmem:[%s2062_s1 + $0x30] sm:$0xff] (!%p197_p9)  ;;  %v294_v12 = vld [vmem:[%s2062_s1 + $0x48] sm:$0xff] (!%p197_p9)  ;;  %v304_v58 = vshrl.u32 (!%p197_p9), %v303_v57, 7  ;;  %s217_s14 = sand.u32 (!%p197_p9), 1, %s1493_s19   ;;  %s1504_s25 = smov (!%p197_p9), 127  }
  0x10   : > { %1373 = vmatprep.subr.bf16.mxu0 (!%p197_p9), %v1372_v3  ;;  %1388 = vmatprep.subr.bf16.mxu1 (!%p197_p9), %v1372_v3  ;;  %v296_v13 = vld [vmem:[%s2062_s1 + $0x58] sm:$0xff] (!%p197_p9)  ;;  %v1378_v14 = vpack.c.bf16 (!%p197_p9), %v291_v11, %v289_v10  ;;  %v293_v16 = vld [vmem:[%s2062_s1 + $0x40] sm:$0xff] (!%p197_p9)  ;;  %v295_v17 = vld [vmem:[%s2062_s1 + $0x50] sm:$0xff] (!%p197_p9)  ;;  %s1168_s23 = sshll.u32 (!%p197_p9), %s217_s14, 7  ;;  %s1276_s30 = sshll.u32 (!%p197_p9), %s1559_s22, 11 }
  0x11   : > { %1375 = vmatpush1.bf16.msra.mxu0 (!%p197_p9), %v1374_v8  ;;  %1392 = vmatpush1.bf16.msra.mxu1 (!%p197_p9), %v1374_v8  ;;  %v1380_v15 = vpack.c.bf16 (!%p197_p9), %v296_v13, %v294_v12  ;;  %v298_v18 = vld [vmem:[%s2062_s1 + $0x68] sm:$0xff] (!%p197_p9)  ;;  %v300_v19 = vld [vmem:[%s2062_s1 + $0x78] sm:$0xff] (!%p197_p9)  ;;  %v1382_v20 = vpack.c.bf16 (!%p197_p9), %v295_v17, %v293_v16  ;;  %v297_v22 = vld [vmem:[%s2062_s1 + $0x60] sm:$0xff] (!%p197_p9)  ;;  %v309_v59 = vsub.s32 (!%p197_p9), 1, %v304_v58  ;;  %v305_v61 = vsub.s32 (!%p197_p9), 0, %v304_v58  ;;  %s1780_s26 = scalar_lea.vmem (!%p197_p9), [#allocation2], %s1168_s23  ;;  %s1935_s8 = scalar_lea.hbm (!%p197_p9), %s2064_s3, %s1276_s30 }
  0x12   : > { %1377 = vmatprep.subr.bf16.mxu0 (!%p197_p9), %v1376_v9  ;;  %1389 = vmatprep.subr.bf16.mxu1 (!%p197_p9), %v1376_v9  ;;  %v1384_v21 = vpack.c.bf16 (!%p197_p9), %v300_v19, %v298_v18  ;;  %v299_v23 = vld [vmem:[%s2062_s1 + $0x70] sm:$0xff] (!%p197_p9)  ;;  %v301_v60 = vld [vmem:[%s2063_s2] sm:$0x3] (!%p197_p9)  ;;  %s1044_s6 = sshll.u32 (!%p197_p9), %s1780_s26, 4  ;;  %s1949_s10 = scalar_lea.sflag (!%p197_p9), [#allocation3], %s217_s14  ;;  %s1937_s6 = int_to_ptr.vmem [resolvable:$true] %s1044_s6 }
  0x13   : > { %v1386_v24 = vpack.c.bf16 (!%p197_p9), %v299_v23, %v297_v22  ;;  %v1748_v62 = vrot.slane (!%p197_p9), %v301_v60, %v309_v59  ;;  %v1751_v1 = vrot.slane (!%p197_p9), %v301_v60, %v305_v61 }
  0x15   : > { %s2075_s11 = smov (!%p1616_p10, %s1169_s11), 63  ;;  %1379 = vmatpush1.bf16.msra.mxu0 %v1378_v14  ;;  %1393 = vmatpush1.bf16.msra.mxu1 %v1378_v14 }
  0x16   : > { %1381 = vmatprep.subr.bf16.mxu0 %v1380_v15  ;;  %1390 = vmatprep.subr.bf16.mxu1 %v1380_v15  ;;  %s1643_s9 = sshll.u32 %s2075_s11, 3  ;;  %s1505_s11 = smov [#allocation2]  }
  0x17   : > { %s1649_s12 = scalar_lea.vmem %s2061_s0, %s1643_s9  ;;  %s1757_s17 = scalar_lea.vmem %s2065_s4, %s1643_s9 }
  0x18   : > { %v253_v25 = vld [vmem:[%s1649_s12] sm:$0xff]  ;;  %v254_v27 = vld [vmem:[%s1649_s12 + $0x8] sm:$0xff]  ;;  %v255_v29 = vld [vmem:[%s1649_s12 + $0x10] sm:$0xff]  ;;  %s1443_s13 = sshll.u32 %s1505_s11, 4  ;;  %s1444_s13 = int_to_ptr.vmem [resolvable:$false] %s1443_s13 }
  0x19   : > { %1383 = vmatpush1.bf16.msra.mxu0 %v1382_v20  ;;  %1394 = vmatpush1.bf16.msra.mxu1 %v1382_v20  ;;  %v269_v26 = vld [vmem:[%s1649_s12 + $0x80] sm:$0xff]  ;;  %v270_v28 = vld [vmem:[%s1649_s12 + $0x88] sm:$0xff]  ;;  %v271_v30 = vld [vmem:[%s1649_s12 + $0x90] sm:$0xff]  ;;  %s1445_s15 = scalar_lea.vmem %s1444_s13, 4096  ;;  %p1446_p0 = scmp.lt.s32.totalorder %s1937_s6, %s1444_s13 }
  0x1a   : > { %1385 = vmatprep.subr.bf16.mxu0 %v1384_v21  ;;  %1391 = vmatprep.subr.bf16.mxu1 %v1384_v21  ;;  %v256_v31 = vld [vmem:[%s1649_s12 + $0x18] sm:$0xff]  ;;  %v257_v33 = vld [vmem:[%s1649_s12 + $0x20] sm:$0xff]  ;;  %v258_v35 = vld [vmem:[%s1649_s12 + $0x28] sm:$0xff] }
  0x1b   : > { %v272_v32 = vld [vmem:[%s1649_s12 + $0x98] sm:$0xff]  ;;  %v273_v34 = vld [vmem:[%s1649_s12 + $0xa0] sm:$0xff]  ;;  %v274_v36 = vld [vmem:[%s1649_s12 + $0xa8] sm:$0xff] }
  0x1c   : > { %v259_v37 = vld [vmem:[%s1649_s12 + $0x30] sm:$0xff]  ;;  %v260_v39 = vld [vmem:[%s1649_s12 + $0x38] sm:$0xff]  ;;  %v261_v41 = vld [vmem:[%s1649_s12 + $0x40] sm:$0xff] }
  0x1d   : > { %1387 = vmatpush1.bf16.msra.mxu0 %v1386_v24  ;;  %1395 = vmatpush1.bf16.msra.mxu1 %v1386_v24  ;;  %v275_v38 = vld [vmem:[%s1649_s12 + $0xb0] sm:$0xff]  ;;  %v276_v40 = vld [vmem:[%s1649_s12 + $0xb8] sm:$0xff]  ;;  %v277_v42 = vld [vmem:[%s1649_s12 + $0xc0] sm:$0xff] }
  0x1e   : > { %v262_v43 = vld [vmem:[%s1649_s12 + $0x48] sm:$0xff]  ;;  %v263_v45 = vld [vmem:[%s1649_s12 + $0x50] sm:$0xff]  ;;  %v264_v47 = vld [vmem:[%s1649_s12 + $0x58] sm:$0xff] }
  0x1f   : > { %v278_v44 = vld [vmem:[%s1649_s12 + $0xc8] sm:$0xff]  ;;  %v279_v46 = vld [vmem:[%s1649_s12 + $0xd0] sm:$0xff]  ;;  %v280_v48 = vld [vmem:[%s1649_s12 + $0xd8] sm:$0xff] }
  0x20   : > { %1175 = vmatmul.mubr.msk.f32.vlgmr.msra.gmra.mrb[0].mxu0 %vm313_vm0, %v253_v25  ;;  %1191 = vmatmul.mubr.msk.f32.vlgmr.msra.gmra.mrb[0].mxu1 %vm313_vm0, %v269_v26  ;;  %v265_v49 = vld [vmem:[%s1649_s12 + $0x60] sm:$0xff]  ;;  %v266_v51 = vld [vmem:[%s1649_s12 + $0x68] sm:$0xff]  ;;  %v267_v53 = vld [vmem:[%s1649_s12 + $0x70] sm:$0xff] }
  0x21   : > { %480 = vmatprep.mubr.f32.mxu0 %v1503_v7  ;;  %576 = vmatprep.mubr.f32.mxu1 %v1503_v7  ;;  %v281_v50 = vld [vmem:[%s1649_s12 + $0xe0] sm:$0xff]  ;;  %v282_v52 = vld [vmem:[%s1649_s12 + $0xe8] sm:$0xff]  ;;  %v283_v54 = vld [vmem:[%s1649_s12 + $0xf0] sm:$0xff] }
  0x22   : > { %v268_v55 = vld [vmem:[%s1649_s12 + $0x78] sm:$0xff] }
  0x23   : > { %v284_v56 = vld [vmem:[%s1649_s12 + $0xf8] sm:$0xff]  ;;  %s1439_s12 = scalar_lea.vmem %s1937_s6, 2048 }
  0x24   : > { %1176 = vmatmul.mubr.msk.f32.gmra.mrb[2].mxu0 %vm313_vm0, %v254_v27  ;;  %1192 = vmatmul.mubr.msk.f32.gmra.mrb[2].mxu1 %vm313_vm0, %v270_v28  ;;  %p1440_p11 = scmp.ne.s32.totalorder %s1937_s6, %s1439_s12  ;;  %p1447_p1 = scmp.lt.s32.totalorder %s1445_s15, %s1439_s12 }
  0x25   : > { %486 = vmatprep.mubr.f32.mxu0 %v1503_v7  ;;  %582 = vmatprep.mubr.f32.mxu1 %v1503_v7 }
  0x26   : > { %p1441_p12 = pnand %p1440_p11, %p1576_p5  ;;  %p1448_p2 = por %p1447_p1, %p1446_p0 }
  0x28   : > { %1177 = vmatmul.mubr.msk.f32.gmra.mrb[4].mxu0 %vm313_vm0, %v255_v29  ;;  %1193 = vmatmul.mubr.msk.f32.gmra.mrb[4].mxu1 %vm313_vm0, %v271_v30  ;;  %p1442_p13 = pneg %p1441_p12 }
  0x29   : > { %492 = vmatprep.mubr.f32.mxu0 %v1503_v7  ;;  %588 = vmatprep.mubr.f32.mxu1 %v1503_v7 }
  0x2a   : > { %p1449_p3 = pnand %p1448_p2, %p1442_p13 }
  0x2c   : > { %1178 = vmatmul.mubr.msk.f32.gmra.mrb[6].mxu0 %vm313_vm0, %v256_v31  ;;  %1194 = vmatmul.mubr.msk.f32.gmra.mrb[6].mxu1 %vm313_vm0, %v272_v32 }
  0x2d   : > { %498 = vmatprep.mubr.f32.mxu0 %v1503_v7  ;;  %594 = vmatprep.mubr.f32.mxu1 %v1503_v7 }
  0x30   : > { %1179 = vmatmul.mubr.msk.f32.gmra.mrb[8].mxu0 %vm313_vm0, %v257_v33  ;;  %1195 = vmatmul.mubr.msk.f32.gmra.mrb[8].mxu1 %vm313_vm0, %v273_v34 }
  0x31   : > { %504 = vmatprep.mubr.f32.mxu0 %v1503_v7  ;;  %600 = vmatprep.mubr.f32.mxu1 %v1503_v7 }
  0x34   : > { %1180 = vmatmul.mubr.msk.f32.gmra.mrb[10].mxu0 %vm313_vm0, %v258_v35  ;;  %1196 = vmatmul.mubr.msk.f32.gmra.mrb[10].mxu1 %vm313_vm0, %v274_v36 }
  0x35   : > { %510 = vmatprep.mubr.f32.mxu0 %v1503_v7  ;;  %606 = vmatprep.mubr.f32.mxu1 %v1503_v7 }
  0x38   : > { %1181 = vmatmul.mubr.msk.f32.gmra.mrb[12].mxu0 %vm313_vm0, %v259_v37  ;;  %1197 = vmatmul.mubr.msk.f32.gmra.mrb[12].mxu1 %vm313_vm0, %v275_v38 }
  0x39   : > { %516 = vmatprep.mubr.f32.mxu0 %v1503_v7  ;;  %612 = vmatprep.mubr.f32.mxu1 %v1503_v7 }
  0x3c   : > { %1182 = vmatmul.mubr.msk.f32.gmra.mrb[14].mxu0 %vm313_vm0, %v260_v39  ;;  %1198 = vmatmul.mubr.msk.f32.gmra.mrb[14].mxu1 %vm313_vm0, %v276_v40 }
  0x3d   : > { %522 = vmatprep.mubr.f32.mxu0 %v1503_v7  ;;  %618 = vmatprep.mubr.f32.mxu1 %v1503_v7 }
  0x40   : > { %1183 = vmatmul.mubr.msk.f32.gmra.mrb[16].mxu0 %vm313_vm0, %v261_v41  ;;  %1199 = vmatmul.mubr.msk.f32.gmra.mrb[16].mxu1 %vm313_vm0, %v277_v42 }
  0x41   : > { %528 = vmatprep.mubr.f32.mxu0 %v1503_v7  ;;  %624 = vmatprep.mubr.f32.mxu1 %v1503_v7 }
  0x44   : > { %1184 = vmatmul.mubr.msk.f32.gmra.mrb[18].mxu0 %vm313_vm0, %v262_v43  ;;  %1200 = vmatmul.mubr.msk.f32.gmra.mrb[18].mxu1 %vm313_vm0, %v278_v44 }
  0x45   : > { %534 = vmatprep.mubr.f32.mxu0 %v1503_v7  ;;  %630 = vmatprep.mubr.f32.mxu1 %v1503_v7 }
  0x48   : > { %1185 = vmatmul.mubr.msk.f32.gmra.mrb[20].mxu0 %vm313_vm0, %v263_v45  ;;  %1201 = vmatmul.mubr.msk.f32.gmra.mrb[20].mxu1 %vm313_vm0, %v279_v46 }
  0x49   : > { %540 = vmatprep.mubr.f32.mxu0 %v1503_v7  ;;  %636 = vmatprep.mubr.f32.mxu1 %v1503_v7 }
  0x4c   : > { %1186 = vmatmul.mubr.msk.f32.gmra.mrb[22].mxu0 %vm313_vm0, %v264_v47  ;;  %1202 = vmatmul.mubr.msk.f32.gmra.mrb[22].mxu1 %vm313_vm0, %v280_v48 }
  0x4d   : > { %546 = vmatprep.mubr.f32.mxu0 %v1503_v7  ;;  %642 = vmatprep.mubr.f32.mxu1 %v1503_v7 }
  0x50   : > { %1187 = vmatmul.mubr.msk.f32.gmra.mrb[24].mxu0 %vm313_vm0, %v265_v49  ;;  %1203 = vmatmul.mubr.msk.f32.gmra.mrb[24].mxu1 %vm313_vm0, %v281_v50 }
  0x51   : > { %552 = vmatprep.mubr.f32.mxu0 %v1503_v7  ;;  %648 = vmatprep.mubr.f32.mxu1 %v1503_v7 }
  0x54   : > { %1188 = vmatmul.mubr.msk.f32.gmra.mrb[26].mxu0 %vm313_vm0, %v266_v51  ;;  %1204 = vmatmul.mubr.msk.f32.gmra.mrb[26].mxu1 %vm313_vm0, %v282_v52 }
  0x55   : > { %558 = vmatprep.mubr.f32.mxu0 %v1503_v7  ;;  %654 = vmatprep.mubr.f32.mxu1 %v1503_v7 }
  0x58   : > { %1189 = vmatmul.mubr.msk.f32.gmra.mrb[28].mxu0 %vm313_vm0, %v267_v53  ;;  %1205 = vmatmul.mubr.msk.f32.gmra.mrb[28].mxu1 %vm313_vm0, %v283_v54 }
  0x59   : > { %564 = vmatprep.mubr.f32.mxu0 %v1503_v7  ;;  %660 = vmatprep.mubr.f32.mxu1 %v1503_v7 }
  0x5c   : > { %1190 = vmatmul.mubr.msk.f32.gmra.mrb[30].mxu0 %vm313_vm0, %v268_v55  ;;  %1206 = vmatmul.mubr.msk.f32.gmra.mrb[30].mxu1 %vm313_vm0, %v284_v56 }
  0xf3   : > { %v476_v63 = vpop.f32.mrb[0].mxu0  ;;  %v572_v0 = vpop.f32.mrb[0].mxu1 }
  0xf4   : > { %v478_v2 = vpop.f32.mrb[1].mxu0  ;;  %v574_v3 = vpop.f32.mrb[1].mxu1  ;;  %v477_v8 = vadd.f32 %v476_v63, %v1751_v1  ;;  %v573_v9 = vadd.f32 %v572_v0, %v1751_v1 }
  0xf5   : > { %v479_v4 = vadd.f32 %v478_v2, %v1748_v62  ;;  %v575_v5 = vadd.f32 %v574_v3, %v1748_v62 }
  0xf7   : > { %828 = vst.msk [vmem:[%s1757_s17] sm:$0xff] %vm827_vm1, %v479_v4  ;;  %844 = vst.msk [vmem:[%s1757_s17 + $0x80] sm:$0xff] %vm827_vm1, %v575_v5  ;;  %v482_v6 = vpop.f32.mrb[2].mxu0  ;;  %v578_v7 = vpop.f32.mrb[2].mxu1  ;;  %892 = vrot.lane.b32.xlu0 %v479_v4, %s1504_s25 }
  0xf8   : > { %v483_v10 = vadd.f32 %v482_v6, %v1751_v1  ;;  %v579_v11 = vadd.f32 %v578_v7, %v1751_v1  ;;  %v484_v12 = vpop.f32.mrb[3].mxu0  ;;  %v580_v13 = vpop.f32.mrb[3].mxu1 }
  0xf9   : > { %v485_v14 = vadd.f32 %v484_v12, %v1748_v62  ;;  %v581_v15 = vadd.f32 %v580_v13, %v1748_v62 }
  0xfa   : > { %v1280_v16 = vpack.c.bf16 %v483_v10, %v477_v8  ;;  %v1320_v17 = vpack.c.bf16 %v579_v11, %v573_v9 }
  0xfb   : > { %829 = vst.msk [vmem:[%s1757_s17 + $0x8] sm:$0xff] %vm827_vm1, %v485_v14  ;;  %845 = vst.msk [vmem:[%s1757_s17 + $0x88] sm:$0xff] %vm827_vm1, %v581_v15  ;;  %926 = vrot.lane.b32.xlu1 %v581_v15, %s1504_s25  ;;  %v488_v18 = vpop.f32.mrb[4].mxu0  ;;  %924 = vrot.lane.b32.xlu0 %v575_v5, %s1504_s25  ;;  %v584_v19 = vpop.f32.mrb[4].mxu1 }
  0xfc   : > { %1281 = vst [vmem:[%s1780_s26] sm:$0xff] %v1280_v16   ;;  %1364 = vst [vmem:[%s1780_s26 + $0x40] sm:$0xff] %v1320_v17   ;;  %v490_v20 = vpop.f32.mrb[5].mxu0  ;;  %v586_v21 = vpop.f32.mrb[5].mxu1  ;;  %v585_v24 = vadd.f32 %v584_v19, %v1751_v1  ;;  %v489_v27 = vadd.f32 %v488_v18, %v1751_v1 }
  0xfd   : > { %v491_v22 = vadd.f32 %v490_v20, %v1748_v62  ;;  %v587_v23 = vadd.f32 %v586_v21, %v1748_v62 }
  0xff   : > { %830 = vst.msk [vmem:[%s1757_s17 + $0x10] sm:$0xff] %vm827_vm1, %v491_v22  ;;  %846 = vst.msk [vmem:[%s1757_s17 + $0x90] sm:$0xff] %vm827_vm1, %v587_v23  ;;  %v494_v25 = vpop.f32.mrb[6].mxu0  ;;  %v590_v26 = vpop.f32.mrb[6].mxu1  ;;  %896 = vrot.lane.b32.xlu1 %v491_v22, %s1504_s25  ;;  %894 = vrot.lane.b32.xlu0 %v485_v14, %s1504_s25 }
 0x100   : > { %v495_v28 = vadd.f32 %v494_v25, %v1751_v1  ;;  %v591_v29 = vadd.f32 %v590_v26, %v1751_v1  ;;  %v496_v30 = vpop.f32.mrb[7].mxu0  ;;  %v592_v31 = vpop.f32.mrb[7].mxu1 }
 0x101   : > { %v497_v32 = vadd.f32 %v496_v30, %v1748_v62  ;;  %v593_v33 = vadd.f32 %v592_v31, %v1748_v62 }
 0x102   : > { %v1285_v34 = vpack.c.bf16 %v495_v28, %v489_v27  ;;  %v1325_v35 = vpack.c.bf16 %v591_v29, %v585_v24 }
 0x103   : > { %831 = vst.msk [vmem:[%s1757_s17 + $0x18] sm:$0xff] %vm827_vm1, %v497_v32  ;;  %v500_v36 = vpop.f32.mrb[8].mxu0  ;;  %847 = vst.msk [vmem:[%s1757_s17 + $0x98] sm:$0xff] %vm827_vm1, %v593_v33  ;;  %898 = vrot.lane.b32.xlu1 %v497_v32, %s1504_s25  ;;  %928 = vrot.lane.b32.xlu0 %v587_v23, %s1504_s25  ;;  %v596_v37 = vpop.f32.mrb[8].mxu1 }
 0x104   : > { %1357 = vst [vmem:[%s1780_s26 + $0x8] sm:$0xff] %v1285_v34   ;;  %1365 = vst [vmem:[%s1780_s26 + $0x48] sm:$0xff] %v1325_v35   ;;  %v502_v38 = vpop.f32.mrb[9].mxu0  ;;  %v598_v39 = vpop.f32.mrb[9].mxu1  ;;  %v597_v42 = vadd.f32 %v596_v37, %v1751_v1  ;;  %v501_v45 = vadd.f32 %v500_v36, %v1751_v1 }
 0x105   : > { %v503_v40 = vadd.f32 %v502_v38, %v1748_v62  ;;  %v599_v41 = vadd.f32 %v598_v39, %v1748_v62 }
 0x107   : > { %832 = vst.msk [vmem:[%s1757_s17 + $0x20] sm:$0xff] %vm827_vm1, %v503_v40  ;;  %848 = vst.msk [vmem:[%s1757_s17 + $0xa0] sm:$0xff] %vm827_vm1, %v599_v41  ;;  %v506_v43 = vpop.f32.mrb[10].mxu0  ;;  %v602_v44 = vpop.f32.mrb[10].mxu1  ;;  %930 = vrot.lane.b32.xlu1 %v593_v33, %s1504_s25  ;;  %900 = vrot.lane.b32.xlu0 %v503_v40, %s1504_s25 }
 0x108   : > { %v507_v46 = vadd.f32 %v506_v43, %v1751_v1  ;;  %v603_v47 = vadd.f32 %v602_v44, %v1751_v1  ;;  %v508_v48 = vpop.f32.mrb[11].mxu0  ;;  %v604_v49 = vpop.f32.mrb[11].mxu1 }
 0x109   : > { %v509_v50 = vadd.f32 %v508_v48, %v1748_v62  ;;  %v605_v51 = vadd.f32 %v604_v49, %v1748_v62 }
 0x10a   : > { %v1290_v52 = vpack.c.bf16 %v507_v46, %v501_v45  ;;  %v1330_v53 = vpack.c.bf16 %v603_v47, %v597_v42 }
 0x10b   : > { %833 = vst.msk [vmem:[%s1757_s17 + $0x28] sm:$0xff] %vm827_vm1, %v509_v50  ;;  %v512_v54 = vpop.f32.mrb[12].mxu0  ;;  %849 = vst.msk [vmem:[%s1757_s17 + $0xa8] sm:$0xff] %vm827_vm1, %v605_v51  ;;  %902 = vrot.lane.b32.xlu1 %v509_v50, %s1504_s25  ;;  %932 = vrot.lane.b32.xlu0 %v599_v41, %s1504_s25  ;;  %v608_v55 = vpop.f32.mrb[12].mxu1 }
 0x10c   : > { %1358 = vst [vmem:[%s1780_s26 + $0x10] sm:$0xff] %v1290_v52   ;;  %1366 = vst [vmem:[%s1780_s26 + $0x50] sm:$0xff] %v1330_v53   ;;  %v514_v56 = vpop.f32.mrb[13].mxu0  ;;  %v610_v57 = vpop.f32.mrb[13].mxu1  ;;  %v609_v60 = vadd.f32 %v608_v55, %v1751_v1  ;;  %v513_v0 = vadd.f32 %v512_v54, %v1751_v1 }
 0x10d   : > { %v515_v58 = vadd.f32 %v514_v56, %v1748_v62  ;;  %v611_v59 = vadd.f32 %v610_v57, %v1748_v62 }
 0x10f   : > { %834 = vst.msk [vmem:[%s1757_s17 + $0x30] sm:$0xff] %vm827_vm1, %v515_v58  ;;  %850 = vst.msk [vmem:[%s1757_s17 + $0xb0] sm:$0xff] %vm827_vm1, %v611_v59  ;;  %v518_v61 = vpop.f32.mrb[14].mxu0  ;;  %v614_v63 = vpop.f32.mrb[14].mxu1  ;;  %934 = vrot.lane.b32.xlu1 %v605_v51, %s1504_s25  ;;  %904 = vrot.lane.b32.xlu0 %v515_v58, %s1504_s25 }
 0x110   : > { %v519_v2 = vadd.f32 %v518_v61, %v1751_v1  ;;  %v615_v3 = vadd.f32 %v614_v63, %v1751_v1  ;;  %v520_v4 = vpop.f32.mrb[15].mxu0  ;;  %v616_v5 = vpop.f32.mrb[15].mxu1 }
 0x111   : > { %v521_v6 = vadd.f32 %v520_v4, %v1748_v62  ;;  %v617_v7 = vadd.f32 %v616_v5, %v1748_v62 }
 0x112   : > { %v1295_v8 = vpack.c.bf16 %v519_v2, %v513_v0  ;;  %v1335_v9 = vpack.c.bf16 %v615_v3, %v609_v60 }
 0x113   : > { %835 = vst.msk [vmem:[%s1757_s17 + $0x38] sm:$0xff] %vm827_vm1, %v521_v6  ;;  %v524_v10 = vpop.f32.mrb[16].mxu0  ;;  %851 = vst.msk [vmem:[%s1757_s17 + $0xb8] sm:$0xff] %vm827_vm1, %v617_v7  ;;  %906 = vrot.lane.b32.xlu1 %v521_v6, %s1504_s25  ;;  %936 = vrot.lane.b32.xlu0 %v611_v59, %s1504_s25  ;;  %v620_v11 = vpop.f32.mrb[16].mxu1 }
 0x114   : > { %1359 = vst [vmem:[%s1780_s26 + $0x18] sm:$0xff] %v1295_v8   ;;  %1367 = vst [vmem:[%s1780_s26 + $0x58] sm:$0xff] %v1335_v9   ;;  %v526_v12 = vpop.f32.mrb[17].mxu0  ;;  %v622_v13 = vpop.f32.mrb[17].mxu1  ;;  %v621_v16 = vadd.f32 %v620_v11, %v1751_v1  ;;  %v525_v19 = vadd.f32 %v524_v10, %v1751_v1 }
 0x115   : > { %v527_v14 = vadd.f32 %v526_v12, %v1748_v62  ;;  %v623_v15 = vadd.f32 %v622_v13, %v1748_v62 }
 0x117   : > { %836 = vst.msk [vmem:[%s1757_s17 + $0x40] sm:$0xff] %vm827_vm1, %v527_v14  ;;  %852 = vst.msk [vmem:[%s1757_s17 + $0xc0] sm:$0xff] %vm827_vm1, %v623_v15  ;;  %v530_v17 = vpop.f32.mrb[18].mxu0  ;;  %v626_v18 = vpop.f32.mrb[18].mxu1  ;;  %938 = vrot.lane.b32.xlu1 %v617_v7, %s1504_s25  ;;  %908 = vrot.lane.b32.xlu0 %v527_v14, %s1504_s25 }
 0x118   : > { %v531_v20 = vadd.f32 %v530_v17, %v1751_v1  ;;  %v627_v21 = vadd.f32 %v626_v18, %v1751_v1  ;;  %v532_v22 = vpop.f32.mrb[19].mxu0  ;;  %v628_v23 = vpop.f32.mrb[19].mxu1 }
 0x119   : > { %v533_v24 = vadd.f32 %v532_v22, %v1748_v62  ;;  %v629_v25 = vadd.f32 %v628_v23, %v1748_v62 }
 0x11a   : > { %v1300_v26 = vpack.c.bf16 %v531_v20, %v525_v19  ;;  %v1340_v27 = vpack.c.bf16 %v627_v21, %v621_v16 }
 0x11b   : > { %837 = vst.msk [vmem:[%s1757_s17 + $0x48] sm:$0xff] %vm827_vm1, %v533_v24  ;;  %v536_v28 = vpop.f32.mrb[20].mxu0  ;;  %853 = vst.msk [vmem:[%s1757_s17 + $0xc8] sm:$0xff] %vm827_vm1, %v629_v25  ;;  %910 = vrot.lane.b32.xlu1 %v533_v24, %s1504_s25  ;;  %940 = vrot.lane.b32.xlu0 %v623_v15, %s1504_s25  ;;  %v632_v29 = vpop.f32.mrb[20].mxu1 }
 0x11c   : > { %1360 = vst [vmem:[%s1780_s26 + $0x20] sm:$0xff] %v1300_v26   ;;  %1368 = vst [vmem:[%s1780_s26 + $0x60] sm:$0xff] %v1340_v27   ;;  %v538_v30 = vpop.f32.mrb[21].mxu0  ;;  %v634_v31 = vpop.f32.mrb[21].mxu1  ;;  %v633_v34 = vadd.f32 %v632_v29, %v1751_v1  ;;  %v537_v37 = vadd.f32 %v536_v28, %v1751_v1 }
 0x11d   : > { %v539_v32 = vadd.f32 %v538_v30, %v1748_v62  ;;  %v635_v33 = vadd.f32 %v634_v31, %v1748_v62 }
 0x11f   : > { %838 = vst.msk [vmem:[%s1757_s17 + $0x50] sm:$0xff] %vm827_vm1, %v539_v32  ;;  %854 = vst.msk [vmem:[%s1757_s17 + $0xd0] sm:$0xff] %vm827_vm1, %v635_v33  ;;  %v542_v35 = vpop.f32.mrb[22].mxu0  ;;  %v638_v36 = vpop.f32.mrb[22].mxu1  ;;  %942 = vrot.lane.b32.xlu1 %v629_v25, %s1504_s25  ;;  %912 = vrot.lane.b32.xlu0 %v539_v32, %s1504_s25 }
 0x120   : > { %v543_v38 = vadd.f32 %v542_v35, %v1751_v1  ;;  %v639_v39 = vadd.f32 %v638_v36, %v1751_v1  ;;  %v544_v40 = vpop.f32.mrb[23].mxu0  ;;  %v640_v41 = vpop.f32.mrb[23].mxu1 }
 0x121   : > { %v545_v42 = vadd.f32 %v544_v40, %v1748_v62  ;;  %v641_v43 = vadd.f32 %v640_v41, %v1748_v62 }
 0x122   : > { %v1305_v44 = vpack.c.bf16 %v543_v38, %v537_v37  ;;  %v1345_v45 = vpack.c.bf16 %v639_v39, %v633_v34 }
 0x123   : > { %839 = vst.msk [vmem:[%s1757_s17 + $0x58] sm:$0xff] %vm827_vm1, %v545_v42  ;;  %v548_v46 = vpop.f32.mrb[24].mxu0  ;;  %855 = vst.msk [vmem:[%s1757_s17 + $0xd8] sm:$0xff] %vm827_vm1, %v641_v43  ;;  %914 = vrot.lane.b32.xlu1 %v545_v42, %s1504_s25  ;;  %944 = vrot.lane.b32.xlu0 %v635_v33, %s1504_s25  ;;  %v644_v47 = vpop.f32.mrb[24].mxu1 }
 0x124   : > { %1361 = vst [vmem:[%s1780_s26 + $0x28] sm:$0xff] %v1305_v44   ;;  %1369 = vst [vmem:[%s1780_s26 + $0x68] sm:$0xff] %v1345_v45   ;;  %v550_v48 = vpop.f32.mrb[25].mxu0  ;;  %v646_v49 = vpop.f32.mrb[25].mxu1  ;;  %v645_v52 = vadd.f32 %v644_v47, %v1751_v1  ;;  %v549_v55 = vadd.f32 %v548_v46, %v1751_v1 }
 0x125   : > { %v551_v50 = vadd.f32 %v550_v48, %v1748_v62  ;;  %v647_v51 = vadd.f32 %v646_v49, %v1748_v62 }
 0x127   : > { %840 = vst.msk [vmem:[%s1757_s17 + $0x60] sm:$0xff] %vm827_vm1, %v551_v50  ;;  %856 = vst.msk [vmem:[%s1757_s17 + $0xe0] sm:$0xff] %vm827_vm1, %v647_v51  ;;  %v554_v53 = vpop.f32.mrb[26].mxu0  ;;  %v650_v54 = vpop.f32.mrb[26].mxu1  ;;  %946 = vrot.lane.b32.xlu1 %v641_v43, %s1504_s25  ;;  %916 = vrot.lane.b32.xlu0 %v551_v50, %s1504_s25 }
 0x128   : > { %v555_v56 = vadd.f32 %v554_v53, %v1751_v1  ;;  %v651_v57 = vadd.f32 %v650_v54, %v1751_v1  ;;  %v556_v58 = vpop.f32.mrb[27].mxu0  ;;  %v652_v59 = vpop.f32.mrb[27].mxu1 }
 0x129   : > { %v557_v60 = vadd.f32 %v556_v58, %v1748_v62  ;;  %v653_v61 = vadd.f32 %v652_v59, %v1748_v62 }
 0x12a   : > { %v1310_v63 = vpack.c.bf16 %v555_v56, %v549_v55  ;;  %v1350_v0 = vpack.c.bf16 %v651_v57, %v645_v52 }
 0x12b   : > { %841 = vst.msk [vmem:[%s1757_s17 + $0x68] sm:$0xff] %vm827_vm1, %v557_v60  ;;  %v560_v2 = vpop.f32.mrb[28].mxu0  ;;  %857 = vst.msk [vmem:[%s1757_s17 + $0xe8] sm:$0xff] %vm827_vm1, %v653_v61  ;;  %918 = vrot.lane.b32.xlu1 %v557_v60, %s1504_s25  ;;  %948 = vrot.lane.b32.xlu0 %v647_v51, %s1504_s25  ;;  %v656_v3 = vpop.f32.mrb[28].mxu1 }
 0x12c   : > { %1362 = vst [vmem:[%s1780_s26 + $0x30] sm:$0xff] %v1310_v63   ;;  %1370 = vst [vmem:[%s1780_s26 + $0x70] sm:$0xff] %v1350_v0   ;;  %v562_v4 = vpop.f32.mrb[29].mxu0  ;;  %v658_v5 = vpop.f32.mrb[29].mxu1  ;;  %v657_v8 = vadd.f32 %v656_v3, %v1751_v1  ;;  %v561_v11 = vadd.f32 %v560_v2, %v1751_v1 }
 0x12d   : > { %v563_v6 = vadd.f32 %v562_v4, %v1748_v62  ;;  %v659_v7 = vadd.f32 %v658_v5, %v1748_v62 }
 0x12f   : > { %842 = vst.msk [vmem:[%s1757_s17 + $0x70] sm:$0xff] %vm827_vm1, %v563_v6  ;;  %858 = vst.msk [vmem:[%s1757_s17 + $0xf0] sm:$0xff] %vm827_vm1, %v659_v7  ;;  %v566_v9 = vpop.f32.mrb[30].mxu0  ;;  %v662_v10 = vpop.f32.mrb[30].mxu1  ;;  %950 = vrot.lane.b32.xlu1 %v653_v61, %s1504_s25  ;;  %920 = vrot.lane.b32.xlu0 %v563_v6, %s1504_s25 }
 0x130   : > { %v567_v12 = vadd.f32 %v566_v9, %v1751_v1  ;;  %v663_v13 = vadd.f32 %v662_v10, %v1751_v1  ;;  %v568_v14 = vpop.f32.mrb[31].mxu0  ;;  %v664_v15 = vpop.f32.mrb[31].mxu1 }
 0x131   : > { %v569_v16 = vadd.f32 %v568_v14, %v1748_v62  ;;  %v665_v17 = vadd.f32 %v664_v15, %v1748_v62 }
 0x132   : > { %v1315_v18 = vpack.c.bf16 %v567_v12, %v561_v11  ;;  %v1355_v19 = vpack.c.bf16 %v663_v13, %v657_v8 }
 0x133   : > { %843 = vst.msk [vmem:[%s1757_s17 + $0x78] sm:$0xff] %vm827_vm1, %v569_v16  ;;  %859 = vst.msk [vmem:[%s1757_s17 + $0xf8] sm:$0xff] %vm827_vm1, %v665_v17  ;;  %922 = vrot.lane.b32.xlu1 %v569_v16, %s1504_s25  ;;  %952 = vrot.lane.b32.xlu0 %v659_v7, %s1504_s25 }
 0x134   : > { %1363 = vst [vmem:[%s1780_s26 + $0x38] sm:$0xff] %v1315_v18   ;;  %1371 = vst [vmem:[%s1780_s26 + $0x78] sm:$0xff] %v1355_v19  }
 0x135   : > { %1452 = shalt.err (!%p1449_p3)
}
 0x136   : > { %s1453_s14 = scalar_lea.hbm %s1935_s8, 2048  ;;  %s1457_s23 = scalar_lea.hbm %s2064_s3, 4096 }
 0x137   : > { %p1454_p4 = scmp.ne.s32.totalorder %s1935_s8, %s1453_s14  ;;  %p1458_p9 = scmp.lt.u32.totalorder %s1935_s8, %s2064_s3 }
 0x138   : > { %p1459_p10 = scmp.lt.u32.totalorder %s1457_s23, %s1453_s14  ;;  %p1461_p12 = scmp.lt.u32.totalorder %s1453_s14, %s1935_s8 }
 0x139   : > { %p1455_p7 = pnand %p1454_p4, %p1576_p5 }
 0x13a   : > { %p1460_p11 = por %p1459_p10, %p1458_p9 }
 0x13b   : > { %p1456_p8 = pneg %p1455_p7 }
 0x13c   : > { %p1462_p13 = por %p1461_p12, %p1460_p11 }
 0x13e   : > { %p1463_p0 = pnand %p1462_p13, %p1456_p8 }
 0x140   : > { %1466 = shalt.err (!%p1463_p0)
}
 0x141   : > { %s1506_s22 = smov 64   ;;  %s1507_s7 = smov 4   ;;  %954 = vrot.lane.b32.xlu1 %v665_v17, %s1504_s25 }
 0x142   : > { %1396 = dma.vmem_to_hbm [thread:$0]  (%p1576_p5), %s1937_s6, 2048, %s1935_s8, %s1949_s10, %s1506_s22, %s1506_s22, %s1507_s7  }
 0x143   : > { %s1978_s13 = scalar_lea.vmem %s2066_s5, %s1643_s9 }
 0x169   : > { %v893_v62 = vpop.permute.xlu0 %892 }
 0x16a   : > { %988 = vst.msk [vmem:[%s1978_s13] sm:$0xff] %vm827_vm1, %v893_v62 }
 0x16d   : > { %v927_v1 = vpop.permute.xlu1 %926  ;;  %v925_v20 = vpop.permute.xlu0 %924 }
 0x16e   : > { %1005 = vst.msk [vmem:[%s1978_s13 + $0x88] sm:$0xff] %vm827_vm1, %v927_v1  ;;  %1004 = vst.msk [vmem:[%s1978_s13 + $0x80] sm:$0xff] %vm827_vm1, %v925_v20 }
 0x171   : > { %v897_v21 = vpop.permute.xlu1 %896  ;;  %v895_v22 = vpop.permute.xlu0 %894 }
 0x172   : > { %990 = vst.msk [vmem:[%s1978_s13 + $0x10] sm:$0xff] %vm827_vm1, %v897_v21  ;;  %989 = vst.msk [vmem:[%s1978_s13 + $0x8] sm:$0xff] %vm827_vm1, %v895_v22 }
 0x175   : > { %v899_v23 = vpop.permute.xlu1 %898  ;;  %v929_v24 = vpop.permute.xlu0 %928 }
 0x176   : > { %991 = vst.msk [vmem:[%s1978_s13 + $0x18] sm:$0xff] %vm827_vm1, %v899_v23  ;;  %1006 = vst.msk [vmem:[%s1978_s13 + $0x90] sm:$0xff] %vm827_vm1, %v929_v24 }
 0x179   : > { %v931_v25 = vpop.permute.xlu1 %930  ;;  %v901_v26 = vpop.permute.xlu0 %900 }
 0x17a   : > { %1007 = vst.msk [vmem:[%s1978_s13 + $0x98] sm:$0xff] %vm827_vm1, %v931_v25  ;;  %992 = vst.msk [vmem:[%s1978_s13 + $0x20] sm:$0xff] %vm827_vm1, %v901_v26 }
 0x17d   : > { %v903_v27 = vpop.permute.xlu1 %902  ;;  %v933_v28 = vpop.permute.xlu0 %932 }
 0x17e   : > { %993 = vst.msk [vmem:[%s1978_s13 + $0x28] sm:$0xff] %vm827_vm1, %v903_v27  ;;  %1008 = vst.msk [vmem:[%s1978_s13 + $0xa0] sm:$0xff] %vm827_vm1, %v933_v28 }
 0x181   : > { %v935_v29 = vpop.permute.xlu1 %934  ;;  %v905_v30 = vpop.permute.xlu0 %904 }
 0x182   : > { %1009 = vst.msk [vmem:[%s1978_s13 + $0xa8] sm:$0xff] %vm827_vm1, %v935_v29  ;;  %994 = vst.msk [vmem:[%s1978_s13 + $0x30] sm:$0xff] %vm827_vm1, %v905_v30 }
 0x185   : > { %v907_v31 = vpop.permute.xlu1 %906  ;;  %v937_v32 = vpop.permute.xlu0 %936 }
 0x186   : > { %995 = vst.msk [vmem:[%s1978_s13 + $0x38] sm:$0xff] %vm827_vm1, %v907_v31  ;;  %1010 = vst.msk [vmem:[%s1978_s13 + $0xb0] sm:$0xff] %vm827_vm1, %v937_v32 }
 0x189   : > { %v939_v33 = vpop.permute.xlu1 %938  ;;  %v909_v34 = vpop.permute.xlu0 %908 }
 0x18a   : > { %1011 = vst.msk [vmem:[%s1978_s13 + $0xb8] sm:$0xff] %vm827_vm1, %v939_v33  ;;  %996 = vst.msk [vmem:[%s1978_s13 + $0x40] sm:$0xff] %vm827_vm1, %v909_v34 }
 0x18d   : > { %v911_v35 = vpop.permute.xlu1 %910  ;;  %v941_v36 = vpop.permute.xlu0 %940 }
 0x18e   : > { %997 = vst.msk [vmem:[%s1978_s13 + $0x48] sm:$0xff] %vm827_vm1, %v911_v35  ;;  %1012 = vst.msk [vmem:[%s1978_s13 + $0xc0] sm:$0xff] %vm827_vm1, %v941_v36 }
 0x191   : > { %v943_v37 = vpop.permute.xlu1 %942  ;;  %v913_v38 = vpop.permute.xlu0 %912 }
 0x192   : > { %1013 = vst.msk [vmem:[%s1978_s13 + $0xc8] sm:$0xff] %vm827_vm1, %v943_v37  ;;  %998 = vst.msk [vmem:[%s1978_s13 + $0x50] sm:$0xff] %vm827_vm1, %v913_v38 }
 0x195   : > { %v915_v39 = vpop.permute.xlu1 %914  ;;  %v945_v40 = vpop.permute.xlu0 %944 }
 0x196   : > { %999 = vst.msk [vmem:[%s1978_s13 + $0x58] sm:$0xff] %vm827_vm1, %v915_v39  ;;  %1014 = vst.msk [vmem:[%s1978_s13 + $0xd0] sm:$0xff] %vm827_vm1, %v945_v40 }
 0x199   : > { %v947_v41 = vpop.permute.xlu1 %946  ;;  %v917_v42 = vpop.permute.xlu0 %916 }
 0x19a   : > { %1015 = vst.msk [vmem:[%s1978_s13 + $0xd8] sm:$0xff] %vm827_vm1, %v947_v41  ;;  %1000 = vst.msk [vmem:[%s1978_s13 + $0x60] sm:$0xff] %vm827_vm1, %v917_v42 }
 0x19d   : > { %v919_v43 = vpop.permute.xlu1 %918  ;;  %v949_v44 = vpop.permute.xlu0 %948 }
 0x19e   : > { %1001 = vst.msk [vmem:[%s1978_s13 + $0x68] sm:$0xff] %vm827_vm1, %v919_v43  ;;  %1016 = vst.msk [vmem:[%s1978_s13 + $0xe0] sm:$0xff] %vm827_vm1, %v949_v44 }
 0x1a1   : > { %v951_v45 = vpop.permute.xlu1 %950  ;;  %v921_v46 = vpop.permute.xlu0 %920 }
 0x1a2   : > { %1017 = vst.msk [vmem:[%s1978_s13 + $0xe8] sm:$0xff] %vm827_vm1, %v951_v45  ;;  %1002 = vst.msk [vmem:[%s1978_s13 + $0x70] sm:$0xff] %vm827_vm1, %v921_v46 }
 0x1a5   : > { %v923_v47 = vpop.permute.xlu1 %922  ;;  %v953_v48 = vpop.permute.xlu0 %952 }
 0x1a6   : > { %1003 = vst.msk [vmem:[%s1978_s13 + $0x78] sm:$0xff] %vm827_vm1, %v923_v47  ;;  %1018 = vst.msk [vmem:[%s1978_s13 + $0xf0] sm:$0xff] %vm827_vm1, %v953_v48 }
 0x1b3   : > { %v955_v49 = vpop.permute.xlu1 %954 }
 0x1b4   : > { %1019 = vst.msk [vmem:[%s1978_s13 + $0xf8] sm:$0xff] %vm827_vm1, %v955_v49 }
 0x1b5 PF: > { %p1402_p5 = scmp.ge.s32.totalorder %s1501_s21, 2  ;;  %s1067_s28 = sand.u32 1, %s1489_s18  }
 0x1b6   : > { %s1068_s9 = scalar_lea.sflag [#allocation3], %s1067_s28 }
 0x1b7   : > { %p1399_p1 = pnand %p1402_p5, %p1580_p6 }
 0x1b9   : > { %1484 = dma.done.wait (!%p1399_p1), %s1068_s9, 2048  }
 0x1ba   : > { %1486 = vsyncadd (!%p1399_p1), %s1068_s9, 4294965248  ;;  %p16_p2 = scmp.ge.s32.totalorder %s1563_s24, 4   ;;  %s2070_s18 = smov %s1493_s19 }
 0x1bb   : > { %s2071_s19 = smov %s1497_s20  ;;  %s2072_s20 = smov %s1574_s27 }
 0x1bc   : > { %s2073_s21 = smov %s1563_s24  ;;  %18 = sbr.rel (!%p16_p2) target bundleno = 3 (0x3), region = 91 }
 0x1c3   :  { %1089 = vsyncpa [#allocation3], 1 }
 0x1c4   :  { %1091 = vsyncpa [#allocation3 + $0x1], 1 }

</bundles_post_ra>
